<compile_context>
chip_gen: v6e
topology: v6e:2x2x1
jax: 0.10.0
libtpu: 0.0.40
codegen_flags: <defaults>
</compile_context>

<pallas_src>
import functools

import jax
import jax.numpy as jnp
from jax.experimental import pallas as pl
from jax.experimental.pallas import tpu as pltpu


LANE = 128      # lane width (last dim granularity)
SUB = 16        # bf16 packs two rows per sublane -> batch tiles multiple of 16


def _round_up(v: int, m: int) -> int:
    return ((v + m - 1) // m) * m


def _cdiv(a: int, b: int) -> int:
    return (a + b - 1) // b


def _vmem_budget_bytes() -> int:
    """Generation-aware usable-VMEM budget (headroom under the physical size)."""
    try:
        kind = jax.devices()[0].device_kind.lower()
    except Exception:
        kind = ""
    if ("v5" in kind) or ("v6" in kind):
        return 96 << 20     # v5e / v6e: 128 MiB physical VMEM
    return 44 << 20         # v7x: 64 MiB physical per TC; also the safe default


def _activation(logits, out_dim: int):
    """f32 logits -> sigmoid (out_dim==1) or numerically-stable softmax."""
    if out_dim == 1:
        return jax.nn.sigmoid(logits)
    m = jnp.max(logits, axis=-1, keepdims=True)
    e = jnp.exp(logits - m)
    # Exact reciprocal: runs once per batch tile, off the DMA-bound hot path.
    return e / jnp.sum(e, axis=-1, keepdims=True)


def _pad2d(a, rows: int, cols: int):
    r, c = a.shape
    if r == rows and c == cols:
        return a                      # no copy when already aligned
    return jnp.pad(a, ((0, rows - r), (0, cols - c)))


# --------------------------------------------------------------------------
# Path A: full-K.  grid = (batch_tiles,), W and bias fully resident in VMEM.
# --------------------------------------------------------------------------
def _logit_fullk_kernel(x_ref, w_ref, b_ref, o_ref, *, out_dim: int):
    # x_ref: (TB, D_pad) f32   w_ref: (D_pad, O_pad) bf16 (resident)
    # b_ref: (1, O_pad) f32    o_ref: (TB, O_pad)
    x_bf = x_ref[...].astype(w_ref.dtype)          # cheap VPU cast, hidden
    logits = jnp.dot(x_bf, w_ref[...], preferred_element_type=jnp.float32)
    logits = logits + b_ref[...]                   # bias added once, in f32
    o_ref[...] = _activation(logits, out_dim).astype(o_ref.dtype)


# --------------------------------------------------------------------------
# Path B: K-tiled.  grid = (batch_tiles, k_tiles), f32 accumulator scratch;
# W is fully resident (sliced with pl.ds) when it fits, else per-K blocks.
# --------------------------------------------------------------------------
def _logit_ktiled_kernel(x_ref, w_ref, b_ref, o_ref, acc_ref, *,
                         out_dim: int, tk: int, w_resident: bool):
    k = pl.program_id(1)

    @pl.when(k == 0)
    def _init():
        acc_ref[...] = jnp.zeros_like(acc_ref)

    x_bf = x_ref[...].astype(w_ref.dtype)
    if w_resident:
        k_off = pl.multiple_of(k * tk, LANE)
        w_blk = w_ref[pl.ds(k_off, tk), :]
    else:
        w_blk = w_ref[...]
    acc_ref[...] += jnp.dot(x_bf, w_blk, preferred_element_type=jnp.float32)

    @pl.when(k == pl.num_programs(1) - 1)
    def _finalize():
        logits = acc_ref[...] + b_ref[...]         # bias added once
        o_ref[...] = _activation(logits, out_dim).astype(o_ref.dtype)


def logit_forward(x, weight, bias, *, mxu_dtype=jnp.bfloat16,
                  force_k_tiling=False, force_w_tiled=False,
                  k_block_target=2048, max_batch_tile=4096):
    """x: (B, D); weight: (O, D) (PyTorch nn.Linear layout); bias: (O,)."""
    B, D = x.shape
    O = weight.shape[0]
    out_dtype = x.dtype

    x_bytes = jnp.dtype(x.dtype).itemsize
    out_bytes = jnp.dtype(out_dtype).itemsize
    w_bytes = jnp.dtype(mxu_dtype).itemsize

    D_pad = _round_up(D, LANE)
    O_pad = _round_up(O, LANE)
    B16 = _round_up(B, SUB)

    budget = _vmem_budget_bytes()
    # Feed both v7x TensorCores whenever the batch allows >=2 tiles (costs
    # only one extra (cheap) grid step on single-TC chips).
    min_batch_tiles = 2 if B16 >= 2 * SUB else 1

    # Bias carries -1e30 in padded output columns so softmax ignores them.
    b_p = jnp.full((1, O_pad), -1e30, dtype=jnp.float32).at[0, :O].set(
        bias.astype(jnp.float32))

    # ---------------- Path A: full-K (preferred) ----------------
    fixed_a = 2 * D_pad * O_pad * w_bytes + 2 * O_pad * 4          # W + bias
    row_a = 2 * D_pad * x_bytes + 2 * O_pad * out_bytes            # x + out (dbl-buf)
    tb_cap_a = (budget - fixed_a) // row_a if budget > fixed_a else 0
    tb_cap_a = min(int(tb_cap_a), max_batch_tile)

    if (not force_k_tiling) and tb_cap_a >= SUB:
        n_b = max(min_batch_tiles, _cdiv(B16, tb_cap_a))
        TB = _round_up(_cdiv(B16, n_b), SUB)
        n_b = _cdiv(B16, TB)
        B_pad = n_b * TB

        x_p = _pad2d(x, B_pad, D_pad)                               # native f32
        w_p = _pad2d(weight.T.astype(mxu_dtype), D_pad, O_pad)

        vmem_needed = (2 * TB * D_pad * x_bytes + fixed_a
                       + 2 * TB * O_pad * out_bytes)
        vmem_limit = int(min(max(vmem_needed * 5 // 4 + (1 << 20), 32 << 20),
                             budget))

        kernel = functools.partial(_logit_fullk_kernel, out_dim=O)
        out_p = pl.pallas_call(
            kernel,
            out_shape=jax.ShapeDtypeStruct((B_pad, O_pad), out_dtype),
            grid_spec=pltpu.PrefetchScalarGridSpec(
                num_scalar_prefetch=0,
                grid=(n_b,),
                in_specs=[
                    pl.BlockSpec((TB, D_pad), lambda i: (i, 0)),        # x tile
                    pl.BlockSpec((D_pad, O_pad), lambda i: (0, 0)),     # W resident
                    pl.BlockSpec((1, O_pad), lambda i: (0, 0)),         # bias resident
                ],
                out_specs=pl.BlockSpec((TB, O_pad), lambda i: (i, 0)),
            ),
            compiler_params=pltpu.CompilerParams(
                dimension_semantics=("parallel",),
                vmem_limit_bytes=vmem_limit,
            ),
        )(x_p, w_p, b_p)
        return out_p[:B, :O]

    # ---------------- Path B: K-tiled fallback ----------------
    chosen = None
    for tk_target in (k_block_target, 1024, 512, 256, 128):
        tk_target = max(LANE, min(tk_target, D_pad))
        n_k = _cdiv(D_pad, tk_target)
        TK = _round_up(_cdiv(D_pad, n_k), LANE)
        n_k = _cdiv(D_pad, TK)
        D_final = n_k * TK
        w_resident = (not force_w_tiled) and \
            (2 * D_final * O_pad * w_bytes) <= (budget // 3)
        fixed_b = ((2 * D_final * O_pad * w_bytes) if w_resident
                   else (2 * TK * O_pad * w_bytes)) + 2 * O_pad * 4
        row_b = 2 * TK * x_bytes + 2 * O_pad * out_bytes + O_pad * 4
        if budget <= fixed_b:
            continue
        tb_cap = min((budget - fixed_b) // row_b, 1024, max_batch_tile)
        if tb_cap < SUB:
            continue
        n_b = max(min_batch_tiles, _cdiv(B16, int(tb_cap)))
        TB = _round_up(_cdiv(B16, n_b), SUB)
        n_b = _cdiv(B16, TB)
        chosen = (TB, TK, n_b, n_k, D_final, w_resident)
        break

    if chosen is None:   # last resort: minimal tiles
        TK = LANE
        n_k = _cdiv(D_pad, TK)
        D_final = n_k * TK
        TB = SUB
        n_b = _cdiv(B16, TB)
        w_resident = False
    else:
        TB, TK, n_b, n_k, D_final, w_resident = chosen
    B_pad = n_b * TB

    x_p = _pad2d(x, B_pad, D_final)                                 # native f32
    w_p = _pad2d(weight.T.astype(mxu_dtype), D_final, O_pad)

    if w_resident:
        w_spec = pl.BlockSpec((D_final, O_pad), lambda i, k: (0, 0))
        w_vmem = 2 * D_final * O_pad * w_bytes
    else:
        w_spec = pl.BlockSpec((TK, O_pad), lambda i, k: (k, 0))
        w_vmem = 2 * TK * O_pad * w_bytes

    vmem_needed = (2 * TB * TK * x_bytes + w_vmem
                   + 2 * TB * O_pad * out_bytes + TB * O_pad * 4
                   + 2 * O_pad * 4)
    vmem_limit = int(min(max(vmem_needed * 5 // 4 + (1 << 20), 32 << 20), budget))

    kernel = functools.partial(_logit_ktiled_kernel, out_dim=O, tk=TK,
                               w_resident=w_resident)
    out_p = pl.pallas_call(
        kernel,
        out_shape=jax.ShapeDtypeStruct((B_pad, O_pad), out_dtype),
        grid_spec=pltpu.PrefetchScalarGridSpec(
            num_scalar_prefetch=0,
            grid=(n_b, n_k),
            in_specs=[
                pl.BlockSpec((TB, TK), lambda i, k: (i, k)),            # x tile
                w_spec,                                                 # W
                pl.BlockSpec((1, O_pad), lambda i, k: (0, 0)),          # bias
            ],
            out_specs=pl.BlockSpec((TB, O_pad), lambda i, k: (i, 0)),
            scratch_shapes=[pltpu.VMEM((TB, O_pad), jnp.float32)],
        ),
        compiler_params=pltpu.CompilerParams(
            dimension_semantics=("parallel", "arbitrary"),
            vmem_limit_bytes=vmem_limit,
        ),
    )(x_p, w_p, b_p)
    return out_p[:B, :O]


def _ref_forward(x, weight, bias, out_dim):
    logits = x @ weight.T + bias
    if out_dim == 1:
        return jax.nn.sigmoid(logits)
    return jax.nn.softmax(logits, axis=-1)


def _make_case(key, batch, input_dim, output_dim):
    k1, k2, k3, key = jax.random.split(key, 4)
    x = jax.random.normal(k1, (batch, input_dim), dtype=jnp.float32)
    bound = 1.0 / (input_dim ** 0.5)
    weight = jax.random.uniform(k2, (output_dim, input_dim),
                                minval=-bound, maxval=bound, dtype=jnp.float32)
    bias = jax.random.uniform(k3, (output_dim,),
                              minval=-bound, maxval=bound, dtype=jnp.float32)
    return key, x, weight, bias


if __name__ == "__main__":
    key = jax.random.PRNGKey(0)
    ok = True

    # Full-K path: sigmoid branch (O=1) and softmax branch (O=4).
    for output_dim in (1, 4):
        key, x, weight, bias = _make_case(key, batch=8, input_dim=32,
                                          output_dim=output_dim)
        out = jax.block_until_ready(logit_forward(x, weight, bias))
        ref = _ref_forward(x, weight, bias, output_dim)
        ok = ok and out.shape == (8, output_dim)
        ok = ok and bool(jnp.all(jnp.isfinite(out)))
        ok = ok and bool(jnp.allclose(out, ref, atol=2e-2, rtol=2e-2))

    # K-tiled fallback path (W resident), exercised at small shapes.
    key, x, weight, bias = _make_case(key, batch=24, input_dim=256, output_dim=4)
    out = jax.block_until_ready(
        logit_forward(x, weight, bias, force_k_tiling=True, k_block_target=128))
    ref = _ref_forward(x, weight, bias, 4)
    ok = ok and out.shape == (24, 4)
    ok = ok and bool(jnp.allclose(out, ref, atol=2e-2, rtol=2e-2))

    # K-tiled fallback path with per-K W blocks (very large D*O case).
    key, x, weight, bias = _make_case(key, batch=8, input_dim=256, output_dim=4)
    out = jax.block_until_ready(
        logit_forward(x, weight, bias, force_k_tiling=True, force_w_tiled=True,
                      k_block_target=128))
    ref = _ref_forward(x, weight, bias, 4)
    ok = ok and out.shape == (8, 4)
    ok = ok and bool(jnp.allclose(out, ref, atol=2e-2, rtol=2e-2))

    print("KERNEL_OK" if ok else "KERNEL_MISMATCH")
</pallas_src>

<mosaic_0001>
module attributes {stable_mosaic.version = 11 : i64} {
  func.func @_logit_fullk_kernel(%arg0: i32, %arg1: memref<16x128xf32, #tpu.memory_space<vmem>>, %arg2: memref<128x128xbf16, #tpu.memory_space<vmem>>, %arg3: memref<1x128xf32, #tpu.memory_space<vmem>>, %arg4: memref<16x128xf32, #tpu.memory_space<vmem>>) attributes {dimension_semantics = [#tpu.dimension_semantics<parallel>], iteration_bounds = array<i64: 1>, scalar_prefetch = 0 : i64, scratch_operands = 0 : i64, tpu.core_type = #tpu.core_type<tc>, window_params = [{transform_indices = @transform_0, window_bounds = array<i64: 16, 128>}, {pipeline_mode = #tpu.pipeline_mode<synchronous>, transform_indices = @transform_1, window_bounds = array<i64: 128, 128>}, {pipeline_mode = #tpu.pipeline_mode<synchronous>, transform_indices = @transform_2, window_bounds = array<i64: 1, 128>}, {transform_indices = @transform_3, window_bounds = array<i64: 16, 128>}]} {
    %c0 = arith.constant 0 : index
    %c0_0 = arith.constant 0 : index
    %0 = vector.load %arg1[%c0, %c0_0] : memref<16x128xf32, #tpu.memory_space<vmem>>, vector<16x128xf32>
    %1 = arith.truncf %0 : vector<16x128xf32> to vector<16x128xbf16>
    %c0_1 = arith.constant 0 : index
    %c0_2 = arith.constant 0 : index
    %2 = vector.load %arg2[%c0_1, %c0_2] : memref<128x128xbf16, #tpu.memory_space<vmem>>, vector<128x128xbf16>
    %cst = arith.constant dense<0.000000e+00> : vector<16x128xf32>
    %3 = tpu.matmul %1, %2, %cst {dimension_numbers = #tpu.dot_dimension_numbers<[1], [0], [0], [1], [0, 0, 1, 1], [], []>} : vector<16x128xbf16>, vector<128x128xbf16>, vector<16x128xf32> -> vector<16x128xf32>
    %c0_3 = arith.constant 0 : index
    %c0_4 = arith.constant 0 : index
    %4 = vector.load %arg3[%c0_3, %c0_4] : memref<1x128xf32, #tpu.memory_space<vmem>>, vector<1x128xf32>
    %5 = vector.broadcast %4 : vector<1x128xf32> to vector<16x128xf32>
    %6 = arith.addf %3, %5 : vector<16x128xf32>
    %7 = arith.negf %6 : vector<16x128xf32>
    %8 = math.exp %7 : vector<16x128xf32>
    %cst_5 = arith.constant 1.000000e+00 : f32
    %9 = vector.broadcast %cst_5 : f32 to vector<16x128xf32>
    %10 = arith.addf %9, %8 : vector<16x128xf32>
    %11 = arith.divf %9, %10 : vector<16x128xf32>
    %c0_6 = arith.constant 0 : index
    %c0_7 = arith.constant 0 : index
    %12 = vector.load %arg4[%c0_6, %c0_7] : memref<16x128xf32, #tpu.memory_space<vmem>>, vector<16x128xf32>
    tpu.vector_store %arg4[%c0_6, %c0_7], %11 {strides = array<i32>} : memref<16x128xf32, #tpu.memory_space<vmem>>, vector<16x128xf32>,
    return
  }
  func.func @transform_0(%arg0: i32) -> (i32, i32) {
    %c0_i32 = arith.constant 0 : i32
    %c0_i32_0 = arith.constant 0 : i32
    return %arg0, %c0_i32 : i32, i32
  }
  func.func @transform_1(%arg0: i32) -> (i32, i32) {
    %c0_i32 = arith.constant 0 : i32
    %c0_i32_0 = arith.constant 0 : i32
    %c0_i32_1 = arith.constant 0 : i32
    return %c0_i32, %c0_i32_0 : i32, i32
  }
  func.func @transform_2(%arg0: i32) -> (i32, i32) {
    %c0_i32 = arith.constant 0 : i32
    %c0_i32_0 = arith.constant 0 : i32
    %c0_i32_1 = arith.constant 0 : i32
    return %c0_i32, %c0_i32_0 : i32, i32
  }
  func.func @transform_3(%arg0: i32) -> (i32, i32) {
    %c0_i32 = arith.constant 0 : i32
    %c0_i32_0 = arith.constant 0 : i32
    return %arg0, %c0_i32 : i32, i32
  }
}

</mosaic_0001>

<bundles_post_ra>
// kernel: tpu_custom_call.1
= control target key start
LH: loop header
LB: loop body
LE: loop exit
PB: predicated region body
PF: predicated region fallthrough
CT: control target
= control target key end

     0   :  { %8 = vsyncpa [#allocation3], 0  ;;  %s369_s0 = inlined_call_operand.hbm [shape: f32[16,128], index: 0, kind: input, shape index: {}]   ;;  %s370_s1 = inlined_call_operand.hbm [shape: bf16[128,128], index: 1, kind: input, shape index: {}]   ;;  %s371_s2 = inlined_call_operand.vmem [shape: f32[1,128], index: 2, kind: input, shape index: {}]   ;;  %s372_s3 = inlined_call_operand.hbm [shape: f32[16,128], index: 3, kind: output, shape index: {}]  }
   0x1   :  { %9 = vsyncpa [#allocation6], 0 }
   0x2   :  { %10 = vsyncpa [#allocation4], 0  ;;  %s322_s12 = smov [#allocation2]  }
   0x3   :  { %s16_s13 = sshll.u32 %s322_s12, 4  ;;  %s17_s13 = int_to_ptr.vmem [resolvable:$true] %s16_s13 }
   0x4   :  { %s264_s14 = scalar_lea.vmem %s17_s13, 256  ;;  %p269_p1 = scmp.lt.s32.totalorder %s17_s13, %s17_s13 }
   0x5   :  { %p265_p0 = scmp.ne.s32.totalorder %s17_s13, %s264_s14  ;;  %p270_p2 = scmp.lt.s32.totalorder %s264_s14, %s264_s14 }
   0x7   :  { %p271_p3 = por %p270_p2, %p269_p1 }
   0x9   :  { %p272_p4 = pnand %p271_p3, %p265_p0 }
   0xb   :  { %275 = shalt.err (!%p272_p4)
}
   0xc   :  { %s323_s15 = smov 128   ;;  %s324_s16 = smov 8  }
   0xd   :  { %22 = dma.hbm_to_vmem [thread:$0]  %s369_s0, 256, %s17_s13, [#allocation3], %s323_s15, %s323_s15, %s324_s16  }
   0xe   :  { %s325_s19 = smov [#allocation5]  }
   0xf   :  { %s28_s20 = sshll.u32 %s325_s19, 4  ;;  %s29_s20 = int_to_ptr.vmem [resolvable:$true] %s28_s20 }
  0x10   :  { %s284_s21 = scalar_lea.vmem %s29_s20, 1024  ;;  %p289_p6 = scmp.lt.s32.totalorder %s29_s20, %s29_s20 }
  0x11   :  { %p285_p5 = scmp.ne.s32.totalorder %s29_s20, %s284_s21  ;;  %p290_p7 = scmp.lt.s32.totalorder %s284_s21, %s284_s21 }
  0x13   :  { %p291_p8 = por %p290_p7, %p289_p6 }
  0x15   :  { %p292_p9 = pnand %p291_p8, %p285_p5 }
  0x17   :  { %295 = shalt.err (!%p292_p9)
}
  0x18   :  { %s326_s22 = smov 64   ;;  %s327_s23 = smov 4  }
  0x19   :  { %34 = dma.hbm_to_vmem [thread:$0]  %s370_s1, 1024, %s29_s20, [#allocation6], %s326_s22, %s326_s22, %s327_s23  }
  0x1a   :  { %316 = dma.done.wait [#allocation3], 256  }
  0x1b   :  { %317 = vsyncadd [#allocation3], 4294967040 }
  0x1c   :  { %318 = dma.done.wait [#allocation6], 1024  }
  0x1d   :  { %319 = vsyncadd [#allocation6], 4294966272  ;;  %v328_v0 = vmov 0.0   ;;  %vm329_vm0 = vmmov 0   ;;  %v240_v1 = vld [vmem:[#allocation5 + $0x38] sm:$0xff]   ;;  %v241_v2 = vld [vmem:[#allocation5 + $0x30] sm:$0xff]  }
  0x1e   :  { %211 = vmatprep.subr.bf16.mxu0 %v328_v0  ;;  %227 = vmatprep.mubr.msk.bf16.mxu0 %vm329_vm0, %v328_v0  ;;  %v242_v3 = vld [vmem:[#allocation5 + $0x28] sm:$0xff]   ;;  %v243_v4 = vld [vmem:[#allocation5 + $0x20] sm:$0xff]   ;;  %v244_v5 = vld [vmem:[#allocation5 + $0x18] sm:$0xff]   ;;  %s330_s26 = smov [#allocation7]  }
  0x1f   :  { %212 = vmatpush3.bf16.msra.mxu0 %v240_v1  ;;  %v245_v6 = vld [vmem:[#allocation5 + $0x10] sm:$0xff]   ;;  %v246_v7 = vld [vmem:[#allocation5 + $0x8] sm:$0xff]   ;;  %v247_v8 = vld [vmem:[#allocation5] sm:$0xff]   ;;  %s178_s27 = sshll.u32 %s330_s26, 4  ;;  %s179_s27 = int_to_ptr.vmem [resolvable:$true] %s178_s27 }
  0x20   :  { %213 = vmatprep.subr.bf16.mxu0 %v328_v0  ;;  %v44_v9 = vld [vmem:[#allocation2] sm:$0xff]  ;;  %v45_v10 = vld [vmem:[#allocation2 + $0x8] sm:$0xff]  ;;  %p301_p11 = scmp.lt.s32.totalorder %s179_s27, %s179_s27 }
  0x21   :  { %v46_v11 = vpack.c.bf16 %v45_v10, %v44_v9  ;;  %v191_v12 = vld [vmem:[%s371_s2] ss:$0 sm:$0xff]  ;;  %s296_s2 = scalar_lea.vmem %s179_s27, 256 }
  0x22   :  { %p297_p10 = scmp.ne.s32.totalorder %s179_s27, %s296_s2  ;;  %p302_p12 = scmp.lt.s32.totalorder %s296_s2, %s296_s2 }
  0x23   :  { %214 = vmatpush3.bf16.msra.mxu0 %v241_v2 }
  0x24   :  { %215 = vmatprep.subr.bf16.mxu0 %v328_v0  ;;  %p303_p13 = por %p302_p12, %p301_p11 }
  0x26   :  { %p304_p0 = pnand %p303_p13, %p297_p10 }
  0x27   :  { %216 = vmatpush3.bf16.msra.mxu0 %v242_v3 }
  0x28   :  { %217 = vmatprep.subr.bf16.mxu0 %v328_v0 }
  0x2b   :  { %218 = vmatpush3.bf16.msra.mxu0 %v243_v4 }
  0x2c   :  { %219 = vmatprep.subr.bf16.mxu0 %v328_v0 }
  0x2f   :  { %220 = vmatpush3.bf16.msra.mxu0 %v244_v5 }
  0x30   :  { %221 = vmatprep.subr.bf16.mxu0 %v328_v0 }
  0x33   :  { %222 = vmatpush3.bf16.msra.mxu0 %v245_v6 }
  0x34   :  { %223 = vmatprep.subr.bf16.mxu0 %v328_v0 }
  0x37   :  { %224 = vmatpush3.bf16.msra.mxu0 %v246_v7 }
  0x38   :  { %225 = vmatprep.subr.bf16.mxu0 %v328_v0 }
  0x3b   :  { %226 = vmatpush3.bf16.msra.mxu0 %v247_v8 }
  0x3e   :  { %228 = vmatmul.mubr.bf16.vlgmr.msra.gmra.mxu0 %v46_v11 }
  0xfe   :  { %v152_v13 = vpop.f32.mrf.mxu0 }
  0xff   :  { %v153_v14 = vadd.f32 %v191_v12, %v152_v13 }
 0x100   :  { %v229_v15 = vpop.f32.mrf.mxu0 }
 0x101   :  { %v200_v16 = vmul.f32 -1.442695, %v153_v14 }
 0x102   :  { %v155_v17 = vpop.f32.mrf.mxu0 }
 0x103   :  { %248 = vpow2.f32 %v200_v16  ;;  %v156_v18 = vadd.f32 %v191_v12, %v155_v17 }
 0x104   :  { %v230_v19 = vpop.f32.mrf.mxu0 }
 0x105   :  { %v201_v20 = vmul.f32 -1.442695, %v156_v18 }
 0x107   :  { %250 = vpow2.f32 %v201_v20 }
 0x110   :  { %v249_v21 = vpop.eup %248 }
 0x111   :  { %v165_v22 = vadd.f32 1.0, %v249_v21 }
 0x113   :  { %252 = vrcp.f32 %v165_v22 }
 0x114   :  { %v251_v23 = vpop.eup %250 }
 0x115   :  { %v166_v24 = vadd.f32 1.0, %v251_v23 }
 0x117   :  { %254 = vrcp.f32 %v166_v24 }
 0x120   :  { %v253_v25 = vpop.eup %252 }
 0x121   :  { %171 = vst [vmem:[#allocation7] sm:$0xff] %v253_v25 }
 0x124   :  { %v255_v26 = vpop.eup %254 }
 0x125   :  { %172 = vst [vmem:[#allocation7 + $0x8] sm:$0xff] %v255_v26 }
 0x126   :  { %307 = shalt.err (!%p304_p0)
}
 0x127   :  { %184 = dma.vmem_to_hbm [thread:$0]  %s179_s27, 256, %s372_s3, [#allocation4], %s323_s15, %s323_s15, %s324_s16  }
 0x128   :  { %320 = dma.done.wait [#allocation4], 256  }
 0x129   :  { %321 = vsyncadd [#allocation4], 4294967040 }
 0x12a   :  { %188 = vsyncpa [#allocation3], 1 }
 0x12b   :  { %189 = vsyncpa [#allocation6], 1 }
 0x12c   :  { %190 = vsyncpa [#allocation4], 1 }

</bundles_post_ra>
